<compile_context>
chip_gen: v5e
topology: v5e:2x2
jax: 0.10.0
libtpu: 0.0.40
codegen_flags: <defaults>
</compile_context>

<pallas_src>
import jax
import jax.numpy as jnp
from jax.experimental import pallas as pl
from jax.experimental.pallas import tpu as pltpu


def simple_model_kernel(xt_ref, w_ref, b_ref, wf_ref, bf_ref, o_ref):
    # xt_ref : (d_in, TB)  VMEM   activation tile, batch on the 128-lane axis
    # w_ref  : (H, d_in)   VMEM   last-layer weight, native PyTorch layout
    # b_ref  : (H, 1)      VMEM   last-layer bias (broadcast along lanes)
    # wf_ref : (1, H)      VMEM   final Linear weight
    # bf_ref : (1, 1)      VMEM   final Linear bias
    # o_ref  : (1, TB)     VMEM   lane-dense output tile
    yt = jnp.dot(w_ref[...], xt_ref[...], preferred_element_type=jnp.float32)
    yt = jnp.maximum(yt + b_ref[...], 0.0)      # ReLU; Dropout = identity (eval)
    o = jnp.dot(wf_ref[...], yt, preferred_element_type=jnp.float32) + bf_ref[...]
    o_ref[...] = o.astype(o_ref.dtype)


def simple_model_forward(x, w_stack, b_stack, w_final, b_final, *, block_b=None):
    B, d_in = x.shape
    L, H, _ = w_stack.shape

    # Dead-layer elimination: only layer L-1 contributes to the output.
    w_last = w_stack[L - 1]                      # (H, d_in), no transpose needed
    b_last = b_stack[L - 1].reshape(H, 1)        # (H, 1)
    wf = w_final.reshape(1, H)                   # (1, H)
    bf = b_final.reshape(1, 1)                   # (1, 1)

    xt = jnp.transpose(x)                        # (d_in, B): batch -> lane axis

    cost = pl.CostEstimate(
        flops=2 * B * d_in * H + 2 * B * H,
        transcendentals=0,
        bytes_accessed=4 * (B * d_in + H * d_in + H + H + 1 + B),
    )
    cparams_kw = dict(vmem_limit_bytes=32 << 20)  # legal on v5e/v6e/v7x

    if block_b is None:
        if B <= 1024:
            block_b = B                          # single block, no pipeline
        else:
            # Lane-axis tile: multiple of 128, capped at 8192 (x tile = 1 MiB
            # f32, x2 pipeline buffers), >=2 grid steps for 2-TC sharding.
            half = pl.cdiv(B, 2)
            half = ((half + 127) // 128) * 128
            block_b = min(8192, half)

    if block_b >= B:
        # Single block: whole (small) operands resident in VMEM, no grid.
        out_t = pl.pallas_call(
            simple_model_kernel,
            out_shape=jax.ShapeDtypeStruct((1, B), jnp.float32),
            cost_estimate=cost,
            compiler_params=pltpu.CompilerParams(**cparams_kw),
        )(xt, w_last, b_last, wf, bf)
    else:
        grid = (pl.cdiv(B, block_b),)
        out_t = pl.pallas_call(
            simple_model_kernel,
            out_shape=jax.ShapeDtypeStruct((1, B), jnp.float32),
            grid=grid,
            in_specs=[
                pl.BlockSpec((d_in, block_b), lambda i: (0, i)),  # activation tile
                pl.BlockSpec((H, d_in), lambda i: (0, 0)),        # resident weight
                pl.BlockSpec((H, 1), lambda i: (0, 0)),           # resident bias
                pl.BlockSpec((1, H), lambda i: (0, 0)),           # final weight
                pl.BlockSpec((1, 1), lambda i: (0, 0)),           # final bias
            ],
            out_specs=pl.BlockSpec((1, block_b), lambda i: (0, i)),  # lane-dense
            compiler_params=pltpu.CompilerParams(
                dimension_semantics=("parallel",), **cparams_kw),
            cost_estimate=cost,
        )(xt, w_last, b_last, wf, bf)

    return out_t.reshape(B, 1)


def _reference(x, w_stack, b_stack, w_final, b_final):
    # Pure-JAX reference with the exact PyTorch loop semantics
    # (each iteration reads the ORIGINAL x, overwriting y).
    y = None
    for l in range(w_stack.shape[0]):
        y = jnp.maximum(x @ w_stack[l].T + b_stack[l], 0.0)
    return y @ w_final.T + b_final


def _make_params(key, batch, input_dim, hidden_dim, num_layers):
    kx, kw, kb, kwf, kbf = jax.random.split(key, 5)
    x = jax.random.normal(kx, (batch, input_dim), dtype=jnp.float32)
    # Deterministic PyTorch-like init (scale 1/sqrt(fan_in)).
    w_stack = jax.random.uniform(
        kw, (num_layers, hidden_dim, input_dim), dtype=jnp.float32,
        minval=-1.0, maxval=1.0) / jnp.sqrt(float(input_dim))
    b_stack = jax.random.uniform(
        kb, (num_layers, hidden_dim), dtype=jnp.float32,
        minval=-1.0, maxval=1.0) / jnp.sqrt(float(input_dim))
    w_final = jax.random.uniform(
        kwf, (1, hidden_dim), dtype=jnp.float32,
        minval=-1.0, maxval=1.0) / jnp.sqrt(float(hidden_dim))
    b_final = jax.random.uniform(
        kbf, (1,), dtype=jnp.float32,
        minval=-1.0, maxval=1.0) / jnp.sqrt(float(hidden_dim))
    return x, w_stack, b_stack, w_final, b_final


if __name__ == "__main__":
    # SimpleModel(input_dim=32, hidden_dim=32, num_layers=3), batch=8 (demo
    # shape) -> single-block, no-grid path.
    key = jax.random.PRNGKey(0)
    x, w_stack, b_stack, w_final, b_final = _make_params(key, 8, 32, 32, 3)

    out = simple_model_forward(x, w_stack, b_stack, w_final, b_final)
    out = jax.block_until_ready(out)
    ref = _reference(x, w_stack, b_stack, w_final, b_final)
    assert out.shape == (8, 1)
    assert jnp.allclose(out, ref, atol=1e-5, rtol=1e-5), "mismatch vs reference (B=8)"

    # Gridded path with a ragged last tile (B not a multiple of block_b):
    # exercises the pipelined, lane-dense output store + masked edge block.
    x2, w2, b2, wf2, bf2 = _make_params(jax.random.PRNGKey(1), 333, 32, 32, 3)
    out2 = simple_model_forward(x2, w2, b2, wf2, bf2, block_b=128)
    out2 = jax.block_until_ready(out2)
    ref2 = _reference(x2, w2, b2, wf2, bf2)
    assert out2.shape == (333, 1)
    assert jnp.allclose(out2, ref2, atol=1e-5, rtol=1e-5), "mismatch vs reference (B=333)"

    print("KERNEL_OK")
</pallas_src>

<mosaic_0001>
module attributes {stable_mosaic.version = 11 : i64} {
  func.func @simple_model_kernel(%arg0: memref<32x8xf32, #tpu.memory_space<vmem>>, %arg1: memref<32x32xf32, #tpu.memory_space<vmem>>, %arg2: memref<32x1xf32, #tpu.memory_space<vmem>>, %arg3: memref<1x32xf32, #tpu.memory_space<vmem>>, %arg4: memref<1x1xf32, #tpu.memory_space<vmem>>, %arg5: memref<1x8xf32, #tpu.memory_space<vmem>>) attributes {dimension_semantics = [], scalar_prefetch = 0 : i64, scratch_operands = 0 : i64, tpu.core_type = #tpu.core_type<tc>} {
    %c0 = arith.constant 0 : index
    %c0_0 = arith.constant 0 : index
    %0 = vector.load %arg1[%c0, %c0_0] : memref<32x32xf32, #tpu.memory_space<vmem>>, vector<32x32xf32>
    %c0_1 = arith.constant 0 : index
    %c0_2 = arith.constant 0 : index
    %1 = vector.load %arg0[%c0_1, %c0_2] : memref<32x8xf32, #tpu.memory_space<vmem>>, vector<32x8xf32>
    %cst = arith.constant dense<0.000000e+00> : vector<32x8xf32>
    %2 = tpu.matmul %0, %1, %cst {dimension_numbers = #tpu.dot_dimension_numbers<[1], [0], [0], [1], [0, 0, 1, 1], [], []>} : vector<32x32xf32>, vector<32x8xf32>, vector<32x8xf32> -> vector<32x8xf32>
    %c0_3 = arith.constant 0 : index
    %c0_4 = arith.constant 0 : index
    %3 = vector.load %arg2[%c0_3, %c0_4] : memref<32x1xf32, #tpu.memory_space<vmem>>, vector<32x1xf32>
    %4 = vector.broadcast %3 : vector<32x1xf32> to vector<32x8xf32>
    %5 = arith.addf %2, %4 : vector<32x8xf32>
    %cst_5 = arith.constant 0.000000e+00 : f32
    %6 = vector.broadcast %cst_5 : f32 to vector<32x8xf32>
    %7 = arith.maximumf %5, %6 : vector<32x8xf32>
    %c0_6 = arith.constant 0 : index
    %c0_7 = arith.constant 0 : index
    %8 = vector.load %arg3[%c0_6, %c0_7] : memref<1x32xf32, #tpu.memory_space<vmem>>, vector<1x32xf32>
    %cst_8 = arith.constant dense<0.000000e+00> : vector<1x8xf32>
    %9 = tpu.matmul %8, %7, %cst_8 {dimension_numbers = #tpu.dot_dimension_numbers<[1], [0], [0], [1], [0, 0, 1, 1], [], []>} : vector<1x32xf32>, vector<32x8xf32>, vector<1x8xf32> -> vector<1x8xf32>
    %c0_9 = arith.constant 0 : index
    %c0_10 = arith.constant 0 : index
    %10 = vector.load %arg4[%c0_9, %c0_10] : memref<1x1xf32, #tpu.memory_space<vmem>>, vector<1x1xf32>
    %11 = vector.broadcast %10 : vector<1x1xf32> to vector<1x8xf32>
    %12 = arith.addf %9, %11 : vector<1x8xf32>
    %c0_11 = arith.constant 0 : index
    %c0_12 = arith.constant 0 : index
    %13 = vector.load %arg5[%c0_11, %c0_12] : memref<1x8xf32, #tpu.memory_space<vmem>>, vector<1x8xf32>
    tpu.vector_store %arg5[%c0_11, %c0_12], %12 {strides = array<i32>} : memref<1x8xf32, #tpu.memory_space<vmem>>, vector<1x8xf32>,
    return
  }
}

</mosaic_0001>

<bundles_post_ra>
// kernel: tpu_custom_call.1
= control target key start
LH: loop header
LB: loop body
LE: loop exit
PB: predicated region body
PF: predicated region fallthrough
CT: control target
= control target key end

     0   :  { %s276_s0 = inlined_call_operand.vmem [shape: f32[32,8], index: 0, kind: input, shape index: {}]   ;;  %s277_s1 = inlined_call_operand.vmem [shape: f32[32,32], index: 1, kind: input, shape index: {}]   ;;  %s278_s2 = inlined_call_operand.vmem [shape: f32[32,1], index: 2, kind: input, shape index: {}]   ;;  %s279_s3 = inlined_call_operand.vmem [shape: f32[1,32], index: 3, kind: input, shape index: {}]   ;;  %s280_s4 = inlined_call_operand.<no memory space> [shape: f32[1,1], index: 4, kind: input, shape index: {}]   ;;  %s281_s5 = inlined_call_operand.hbm [shape: f32[1,8], index: 5, kind: output, shape index: {}]  }
   0x1   :  { %v10_v0 = vstv %s280_s4 }
   0x2   :  { %11 = vst [vmem:[#allocation2] sm:$0x1] %v10_v0 }
   0x3   :  { %v30_v1 = vld [vmem:[%s276_s0 + $0x18] sm:$0xff]  ;;  %v29_v2 = vld [vmem:[%s276_s0 + $0x10] sm:$0xff]  ;;  %v28_v3 = vld [vmem:[%s276_s0 + $0x8] sm:$0xff]  ;;  %v194_v4 = vmov 0  }
   0x4   :  { %156 = vmatpush.msra.mxu3 %v30_v1  ;;  %155 = vmatpush.msra.mxu2 %v30_v1  ;;  %v34_v5 = vld [vmem:[%s278_s2 + $0x18] sm:$0xff]  ;;  %v27_v6 = vld [vmem:[%s276_s0] sm:$0xff] }
   0x5   :  { %80 = vmatpush.msra.mxu0 %v30_v1  ;;  %165 = vset.pattern.permute.xlu0 %v194_v4 }
   0x6   :  { %158 = vmatpush.msra.mxu3 %v29_v2  ;;  %157 = vmatpush.msra.mxu2 %v29_v2 }
   0x7   :  { %81 = vmatpush.msra.mxu0 %v29_v2  ;;  %52 = vperm.xlu0 %165, %v34_v5  }
   0x8   :  { %12 = vsyncpa [#allocation4], 0  ;;  %160 = vmatpush.msra.mxu3 %v28_v3  ;;  %v25_v7 = vld [vmem:[%s277_s1 + $0x10] sm:$0xff]  ;;  %vm55_vm0 = vcmask 261120   ;;  %159 = vmatpush.msra.mxu2 %v28_v3  ;;  %v24_v8 = vld [vmem:[%s277_s1 + $0x8] sm:$0xff]  ;;  %s195_s17 = smov [#allocation3]  }
   0x9   :  { %82 = vmatpush.msra.mxu0 %v28_v3  ;;  %166 = vset.pattern.permute.xlu1 %v194_v4  ;;  %v32_v9 = vld [vmem:[%s278_s2 + $0x8] sm:$0xff]  ;;  %v23_v10 = vld [vmem:[%s277_s1] sm:$0xff]  ;;  %v33_v11 = vld [vmem:[%s278_s2 + $0x10] sm:$0xff]  ;;  %s139_s18 = sshll.u32 %s195_s17, 4  ;;  %s141_s21 = sshll.u32 %s281_s5, 4  ;;  %vm132_vm1 = vcmask 57344   ;;  %s140_s18 = int_to_ptr.vmem [resolvable:$true] %s139_s18  ;;  %s142_s21 = int_to_ptr.hbm [resolvable:$true] %s141_s21 }
   0xa   :  { %162 = vmatpush.msra.mxu3 %v27_v6  ;;  %161 = vmatpush.msra.mxu2 %v27_v6  ;;  %v26_v12 = vld [vmem:[%s277_s1 + $0x18] sm:$0xff]  ;;  %v31_v13 = vld [vmem:[%s278_s2] sm:$0xff] }
   0xb   :  { %152 = vmatmul.msk.f32.vlgmr.msra.gmra.mxu3 %vm55_vm0, %v25_v7  ;;  %151 = vmatmul.msk.f32.vlgmr.msra.gmra.mxu2 %vm55_vm0, %v24_v8  ;;  %v102_v14 = vld [vmem:[#allocation2] sm:$0x1] }
   0xc   :  { %83 = vmatpush.msra.mxu0 %v27_v6  ;;  %42 = vperm.xlu1 %166, %v32_v9   ;;  %v101_v31 = vld [vmem:[%s279_s3] sm:$0x1] }
   0xd   :  { %150 = vmatmul.msk.f32.vlgmr.msra.gmra.mxu0 %vm55_vm0, %v23_v10  ;;  %167 = vset.pattern.permute.xlu2 %v194_v4 }
   0xe   :  { %105 = vperm.xlu2 %167, %v102_v14  }
   0xf   :  { %47 = vperm.xlu0 %165, %v33_v11  }
  0x13   :  { %153 = vmatmul.msk.f32.gmra.mxu3 %vm55_vm0, %v26_v12 }
  0x14   :  { %37 = vperm.xlu1 %166, %v31_v13  }
  0x68   :  { %v106_v32 = vpop.permute.xlu2 %105 }
  0x69   :  { %v108_v33 = vperm.slane %v106_v32, 0 }
  0x79   :  { %v53_v15 = vpop.permute.xlu0 %52 }
  0x7e   :  { %v43_v16 = vpop.permute.xlu1 %42 }
  0x81   :  { %v48_v18 = vpop.permute.xlu0 %47 }
  0x86   :  { %v38_v23 = vpop.permute.xlu1 %37 }
  0x8a   :  { %v85_v24 = vpop.f32.mrf.mxu0 }
  0x8b   :  { %v86_v28 = vadd.f32 %v85_v24, %v38_v23 }
  0x8d   :  { %v97_v30 = vmax.f32 %v86_v28, 0.0 }
  0x8e   :  { %v91_v17 = vpop.f32.mrf.mxu3  ;;  %v88_v19 = vpop.f32.mrf.mxu2 }
  0x8f   :  { %v92_v21 = vadd.f32 %v91_v17, %v48_v18  ;;  %v89_v25 = vadd.f32 %v88_v19, %v43_v16 }
  0x91   :  { %v99_v27 = vmax.f32 %v92_v21, 0.0  ;;  %v98_v29 = vmax.f32 %v89_v25, 0.0 }
  0x96   :  { %v94_v20 = vpop.f32.mrf.mxu3 }
  0x97   :  { %v95_v22 = vadd.f32 %v94_v20, %v53_v15 }
  0x99   :  { %v100_v26 = vmax.f32 %v95_v22, 0.0 }
  0x9b   :  { %124 = vmatpush.msra.mxu1 %v100_v26 }
  0x9d   :  { %125 = vmatpush.msra.mxu1 %v99_v27 }
  0x9f   :  { %126 = vmatpush.msra.mxu1 %v98_v29 }
  0xa1   :  { %127 = vmatpush.msra.mxu1 %v97_v30 }
  0xa2   :  { %154 = vmatmul.msk.f32.vlgmr.msra.gmra.mxu1 %vm55_vm0, %v101_v31 }
 0x11f   :  { %v129_v34 = vpop.f32.mrf.mxu1 }
 0x120   :  { %v130_v35 = vadd.f32 %v129_v34, %v108_v33 }
 0x122   :  { %133 = vst.msk [vmem:[#allocation3] sm:$0x1] %vm132_vm1, %v130_v35 }
 0x123   :  { %144 = dma.vmem_to_hbm [thread:$0]  %s140_s18, 16, %s142_s21, [#allocation4]  }
 0x124   :  { %192 = dma.done.wait [#allocation4], 16  }
 0x125   :  { %193 = vsyncadd [#allocation4], 4294967280 }
 0x126   :  { %149 = vsyncpa [#allocation4], 1 }

</bundles_post_ra>
